<compile_context>
chip_gen: v6e
topology: v6e:2x2x1
jax: 0.10.0
libtpu: 0.0.40
codegen_flags: <defaults>
</compile_context>

<pallas_src>
import math
import functools

import jax
import jax.numpy as jnp
from jax import lax
from jax.experimental import pallas as pl
from jax.experimental.pallas import tpu as pltpu


# ---------------------------------------------------------------------------
# Fused attention kernel: one grid step = one batch element, all heads.
# ---------------------------------------------------------------------------
def _fused_attn_kernel(x_ref, wq_ref, wk_ref, wv_ref, bq_ref, bk_ref, bv_ref,
                       wo_ref, bo_ref, m_ref, o_ref, *, num_head, head_dim):
    # x_ref : (1, S, dim)  bf16      wq/wk/wv_ref : (H, dim, D) bf16
    # bq/bk/bv_ref : (H, 1, D) f32   wo_ref : (H, D, dim) bf16
    # bo_ref : (1, dim) f32          m_ref : (1, 1, S) f32
    x = x_ref[0]                                   # (S, dim) bf16, resident in VMEM
    neg_mask = 1.0e6 * (1.0 - m_ref[0])            # (1, S) f32
    scale = 1.0 / math.sqrt(head_dim)

    out_acc = bo_ref[...]                          # (1, dim) f32, broadcasts over rows

    # Static unroll over heads (small H); everything stays in VMEM / vregs.
    for h in range(num_head):
        # Per-head projections: bf16 MXU operands, f32 accumulation.
        q = jnp.dot(x, wq_ref[h], preferred_element_type=jnp.float32) + bq_ref[h]  # (S, D) f32
        k = jnp.dot(x, wk_ref[h], preferred_element_type=jnp.float32) + bk_ref[h]
        v = jnp.dot(x, wv_ref[h], preferred_element_type=jnp.float32) + bv_ref[h]

        # scores = Q K^T / sqrt(D): contract last axes directly (no k.T transpose).
        s = lax.dot_general(
            q.astype(jnp.bfloat16), k.astype(jnp.bfloat16),
            (((1,), (1,)), ((), ())),
            preferred_element_type=jnp.float32) * scale                             # (S, S) f32
        s = s - neg_mask
        # Numerically-stable softmax in f32; divide via EUP reciprocal.
        s = s - jnp.max(s, axis=-1, keepdims=True)
        p = jnp.exp(s)
        attn = p * pl.reciprocal(jnp.sum(p, axis=-1, keepdims=True), approx=True)

        # attn @ V, then fold the per-head slice of the output projection:
        #   ctx @ Wff == sum_h ctx_h @ Wff[h*D:(h+1)*D, :]
        ctx = jnp.dot(attn.astype(jnp.bfloat16), v.astype(jnp.bfloat16),
                      preferred_element_type=jnp.float32)                           # (S, D) f32
        out_acc = out_acc + jnp.dot(ctx.astype(jnp.bfloat16), wo_ref[h],
                                    preferred_element_type=jnp.float32)             # (S, dim)

    o_ref[0] = out_acc.astype(o_ref.dtype)


def attention_forward(params, X, mask, *, num_head, head_dim):
    """X: (B, S, dim) ; mask: (B, S). Returns (B, S, dim) float32."""
    B, S, dim = X.shape
    H, D = num_head, head_dim

    # One-time (trace-level) parameter reorganization into per-head stacks so the
    # kernel selects heads by ref indexing instead of XLA transposes on activations.
    def stack_in(w):   # (dim, H*D) -> (H, dim, D)
        return w.reshape(dim, H, D).transpose(1, 0, 2)

    wq3 = stack_in(params["wq"]).astype(jnp.bfloat16)
    wk3 = stack_in(params["wk"]).astype(jnp.bfloat16)
    wv3 = stack_in(params["wv"]).astype(jnp.bfloat16)
    bq3 = params["bq"].reshape(H, 1, D).astype(jnp.float32)
    bk3 = params["bk"].reshape(H, 1, D).astype(jnp.float32)
    bv3 = params["bv"].reshape(H, 1, D).astype(jnp.float32)
    wo3 = params["wo"].reshape(H, D, dim).astype(jnp.bfloat16)
    bo2 = params["bo"].reshape(1, dim).astype(jnp.float32)
    mask3 = mask.reshape(B, 1, S).astype(jnp.float32)
    x_bf16 = X.astype(jnp.bfloat16)

    kernel = functools.partial(_fused_attn_kernel, num_head=H, head_dim=D)

    return pl.pallas_call(
        kernel,
        out_shape=jax.ShapeDtypeStruct((B, S, dim), jnp.float32),
        grid=(B,),
        in_specs=[
            pl.BlockSpec((1, S, dim), lambda b: (b, 0, 0)),   # X        (per batch)
            pl.BlockSpec((H, dim, D), lambda b: (0, 0, 0)),   # Wq       (whole, resident)
            pl.BlockSpec((H, dim, D), lambda b: (0, 0, 0)),   # Wk
            pl.BlockSpec((H, dim, D), lambda b: (0, 0, 0)),   # Wv
            pl.BlockSpec((H, 1, D), lambda b: (0, 0, 0)),     # bq
            pl.BlockSpec((H, 1, D), lambda b: (0, 0, 0)),     # bk
            pl.BlockSpec((H, 1, D), lambda b: (0, 0, 0)),     # bv
            pl.BlockSpec((H, D, dim), lambda b: (0, 0, 0)),   # Wff
            pl.BlockSpec((1, dim), lambda b: (0, 0)),         # bff
            pl.BlockSpec((1, 1, S), lambda b: (b, 0, 0)),     # mask     (per batch)
        ],
        out_specs=pl.BlockSpec((1, S, dim), lambda b: (b, 0, 0)),
        compiler_params=pltpu.CompilerParams(
            dimension_semantics=("parallel",),        # shards over the 2 TCs on v7x
            vmem_limit_bytes=32 * 1024 * 1024,        # > v5e's 16 MiB scoped default
        ),
    )(x_bf16, wq3, wk3, wv3, bq3, bk3, bv3, wo3, bo2, mask3)


# ---------------------------------------------------------------------------
# Parameter init (nn.Linear-like uniform), weights stored as (in, out)
# ---------------------------------------------------------------------------
def init_attention_params(key, dim, num_head, head_dim):
    hd = num_head * head_dim
    ks = jax.random.split(key, 8)

    def lin(kw, kb, fan_in, fan_out):
        bound = 1.0 / math.sqrt(fan_in)
        w = jax.random.uniform(kw, (fan_in, fan_out), jnp.float32, -bound, bound)
        b = jax.random.uniform(kb, (fan_out,), jnp.float32, -bound, bound)
        return w, b

    wq, bq = lin(ks[0], ks[1], dim, hd)
    wk, bk = lin(ks[2], ks[3], dim, hd)
    wv, bv = lin(ks[4], ks[5], dim, hd)
    wo, bo = lin(ks[6], ks[7], hd, dim)
    return dict(wq=wq, bq=bq, wk=wk, bk=bk, wv=wv, bv=bv, wo=wo, bo=bo)


# ---------------------------------------------------------------------------
# Pure-JAX f32 reference (mirrors the PyTorch forward) for correctness check
# ---------------------------------------------------------------------------
def attention_reference(params, X, mask, *, num_head, head_dim):
    B, S, dim = X.shape
    H, D = num_head, head_dim
    q = (X @ params["wq"] + params["bq"]).reshape(B, S, H, D).transpose(0, 2, 1, 3)
    k = (X @ params["wk"] + params["bk"]).reshape(B, S, H, D).transpose(0, 2, 1, 3)
    v = (X @ params["wv"] + params["bv"]).reshape(B, S, H, D).transpose(0, 2, 1, 3)
    dot = jnp.einsum("bhqd,bhkd->bhqk", q, k) / math.sqrt(D)
    dot = dot - 1.0e6 * (1.0 - mask[:, None, None, :])
    attn = jax.nn.softmax(dot, axis=-1)
    ctx = jnp.einsum("bhqk,bhkd->bhqd", attn, v)
    ctx = ctx.transpose(0, 2, 1, 3).reshape(B, S, H * D)
    return ctx @ params["wo"] + params["bo"]


# ---------------------------------------------------------------------------
if __name__ == "__main__":
    # config: transformer_dim=32, num_head=2, head_dim=16, attn_type='softmax',
    #         attention_dropout=0.0
    B, S, dim, num_head, head_dim = 2, 8, 32, 2, 16

    key = jax.random.PRNGKey(0)
    k_param, k_x = jax.random.split(key)
    params = init_attention_params(k_param, dim, num_head, head_dim)

    X = jax.random.normal(k_x, (B, S, dim), dtype=jnp.float32)
    # mask: first sequence fully valid, second sequence has last 3 tokens masked out
    mask = jnp.ones((B, S), dtype=jnp.float32)
    mask = mask.at[1, S - 3:].set(0.0)

    out = attention_forward(params, X, mask, num_head=num_head, head_dim=head_dim)
    out = jax.block_until_ready(out)

    ref = attention_reference(params, X, mask, num_head=num_head, head_dim=head_dim)
    assert out.shape == (B, S, dim)
    # Kernel runs bf16 MXU operands (+ approx reciprocal) vs. a pure-f32 reference,
    # so tolerance is set for bf16-class error (~1e-2), still far below any real bug.
    assert jnp.allclose(out, ref, atol=5e-2, rtol=5e-2), "mismatch vs reference"

    print("KERNEL_OK")
</pallas_src>

<mosaic_0001>
module attributes {stable_mosaic.version = 11 : i64} {
  func.func @_fused_attn_kernel(%arg0: i32, %arg1: memref<1x8x32xbf16, #tpu.memory_space<vmem>>, %arg2: memref<2x32x16xbf16, #tpu.memory_space<vmem>>, %arg3: memref<2x32x16xbf16, #tpu.memory_space<vmem>>, %arg4: memref<2x32x16xbf16, #tpu.memory_space<vmem>>, %arg5: memref<2x1x16xf32, #tpu.memory_space<vmem>>, %arg6: memref<2x1x16xf32, #tpu.memory_space<vmem>>, %arg7: memref<2x1x16xf32, #tpu.memory_space<vmem>>, %arg8: memref<2x16x32xbf16, #tpu.memory_space<vmem>>, %arg9: memref<1x32xf32, #tpu.memory_space<vmem>>, %arg10: memref<1x1x8xf32, #tpu.memory_space<vmem>>, %arg11: memref<1x8x32xf32, #tpu.memory_space<vmem>>) attributes {dimension_semantics = [#tpu.dimension_semantics<parallel>], iteration_bounds = array<i64: 2>, scalar_prefetch = 0 : i64, scratch_operands = 0 : i64, tpu.core_type = #tpu.core_type<tc>, window_params = [{transform_indices = @transform_0, window_bounds = array<i64: 1, 8, 32>}, {pipeline_mode = #tpu.pipeline_mode<synchronous>, transform_indices = @transform_1, window_bounds = array<i64: 2, 32, 16>}, {pipeline_mode = #tpu.pipeline_mode<synchronous>, transform_indices = @transform_2, window_bounds = array<i64: 2, 32, 16>}, {pipeline_mode = #tpu.pipeline_mode<synchronous>, transform_indices = @transform_3, window_bounds = array<i64: 2, 32, 16>}, {pipeline_mode = #tpu.pipeline_mode<synchronous>, transform_indices = @transform_4, window_bounds = array<i64: 2, 1, 16>}, {pipeline_mode = #tpu.pipeline_mode<synchronous>, transform_indices = @transform_5, window_bounds = array<i64: 2, 1, 16>}, {pipeline_mode = #tpu.pipeline_mode<synchronous>, transform_indices = @transform_6, window_bounds = array<i64: 2, 1, 16>}, {pipeline_mode = #tpu.pipeline_mode<synchronous>, transform_indices = @transform_7, window_bounds = array<i64: 2, 16, 32>}, {pipeline_mode = #tpu.pipeline_mode<synchronous>, transform_indices = @transform_8, window_bounds = array<i64: 1, 32>}, {transform_indices = @transform_9, window_bounds = array<i64: 1, 1, 8>}, {transform_indices = @transform_10, window_bounds = array<i64: 1, 8, 32>}]} {
    %c0 = arith.constant 0 : index
    %c0_0 = arith.constant 0 : index
    %c0_1 = arith.constant 0 : index
    %0 = vector.load %arg1[%c0, %c0_0, %c0_1] : memref<1x8x32xbf16, #tpu.memory_space<vmem>>, vector<1x8x32xbf16>
    %1 = vector.shape_cast %0 : vector<1x8x32xbf16> to vector<8x32xbf16>
    %c0_2 = arith.constant 0 : index
    %c0_3 = arith.constant 0 : index
    %c0_4 = arith.constant 0 : index
    %2 = vector.load %arg10[%c0_2, %c0_3, %c0_4] : memref<1x1x8xf32, #tpu.memory_space<vmem>>, vector<1x1x8xf32>
    %3 = vector.shape_cast %2 : vector<1x1x8xf32> to vector<1x8xf32>
    %cst = arith.constant 1.000000e+00 : f32
    %4 = vector.broadcast %cst : f32 to vector<1x8xf32>
    %5 = arith.subf %4, %3 : vector<1x8xf32>
    %cst_5 = arith.constant 1.000000e+06 : f32
    %6 = vector.broadcast %cst_5 : f32 to vector<1x8xf32>
    %7 = arith.mulf %6, %5 : vector<1x8xf32>
    %c0_6 = arith.constant 0 : index
    %c0_7 = arith.constant 0 : index
    %8 = vector.load %arg9[%c0_6, %c0_7] : memref<1x32xf32, #tpu.memory_space<vmem>>, vector<1x32xf32>
    %c0_8 = arith.constant 0 : index
    %c0_9 = arith.constant 0 : index
    %c0_10 = arith.constant 0 : index
    %9 = vector.load %arg2[%c0_8, %c0_9, %c0_10] : memref<2x32x16xbf16, #tpu.memory_space<vmem>>, vector<1x32x16xbf16>
    %10 = vector.shape_cast %9 : vector<1x32x16xbf16> to vector<32x16xbf16>
    %cst_11 = arith.constant dense<0.000000e+00> : vector<8x16xf32>
    %11 = tpu.matmul %1, %10, %cst_11 {dimension_numbers = #tpu.dot_dimension_numbers<[1], [0], [0], [1], [0, 0, 1, 1], [], []>} : vector<8x32xbf16>, vector<32x16xbf16>, vector<8x16xf32> -> vector<8x16xf32>
    %c0_12 = arith.constant 0 : index
    %c0_13 = arith.constant 0 : index
    %c0_14 = arith.constant 0 : index
    %12 = vector.load %arg5[%c0_12, %c0_13, %c0_14] : memref<2x1x16xf32, #tpu.memory_space<vmem>>, vector<1x1x16xf32>
    %13 = vector.shape_cast %12 : vector<1x1x16xf32> to vector<1x16xf32>
    %14 = vector.broadcast %13 : vector<1x16xf32> to vector<8x16xf32>
    %15 = arith.addf %11, %14 : vector<8x16xf32>
    %c0_15 = arith.constant 0 : index
    %c0_16 = arith.constant 0 : index
    %c0_17 = arith.constant 0 : index
    %16 = vector.load %arg3[%c0_15, %c0_16, %c0_17] : memref<2x32x16xbf16, #tpu.memory_space<vmem>>, vector<1x32x16xbf16>
    %17 = vector.shape_cast %16 : vector<1x32x16xbf16> to vector<32x16xbf16>
    %cst_18 = arith.constant dense<0.000000e+00> : vector<8x16xf32>
    %18 = tpu.matmul %1, %17, %cst_18 {dimension_numbers = #tpu.dot_dimension_numbers<[1], [0], [0], [1], [0, 0, 1, 1], [], []>} : vector<8x32xbf16>, vector<32x16xbf16>, vector<8x16xf32> -> vector<8x16xf32>
    %c0_19 = arith.constant 0 : index
    %c0_20 = arith.constant 0 : index
    %c0_21 = arith.constant 0 : index
    %19 = vector.load %arg6[%c0_19, %c0_20, %c0_21] : memref<2x1x16xf32, #tpu.memory_space<vmem>>, vector<1x1x16xf32>
    %20 = vector.shape_cast %19 : vector<1x1x16xf32> to vector<1x16xf32>
    %21 = vector.broadcast %20 : vector<1x16xf32> to vector<8x16xf32>
    %22 = arith.addf %18, %21 : vector<8x16xf32>
    %c0_22 = arith.constant 0 : index
    %c0_23 = arith.constant 0 : index
    %c0_24 = arith.constant 0 : index
    %23 = vector.load %arg4[%c0_22, %c0_23, %c0_24] : memref<2x32x16xbf16, #tpu.memory_space<vmem>>, vector<1x32x16xbf16>
    %24 = vector.shape_cast %23 : vector<1x32x16xbf16> to vector<32x16xbf16>
    %cst_25 = arith.constant dense<0.000000e+00> : vector<8x16xf32>
    %25 = tpu.matmul %1, %24, %cst_25 {dimension_numbers = #tpu.dot_dimension_numbers<[1], [0], [0], [1], [0, 0, 1, 1], [], []>} : vector<8x32xbf16>, vector<32x16xbf16>, vector<8x16xf32> -> vector<8x16xf32>
    %c0_26 = arith.constant 0 : index
    %c0_27 = arith.constant 0 : index
    %c0_28 = arith.constant 0 : index
    %26 = vector.load %arg7[%c0_26, %c0_27, %c0_28] : memref<2x1x16xf32, #tpu.memory_space<vmem>>, vector<1x1x16xf32>
    %27 = vector.shape_cast %26 : vector<1x1x16xf32> to vector<1x16xf32>
    %28 = vector.broadcast %27 : vector<1x16xf32> to vector<8x16xf32>
    %29 = arith.addf %25, %28 : vector<8x16xf32>
    %30 = arith.truncf %15 : vector<8x16xf32> to vector<8x16xbf16>
    %31 = arith.truncf %22 : vector<8x16xf32> to vector<8x16xbf16>
    %cst_29 = arith.constant dense<0.000000e+00> : vector<8x8xf32>
    %32 = tpu.matmul %30, %31, %cst_29 {dimension_numbers = #tpu.dot_dimension_numbers<[1], [1], [0], [0], [0, 0, 1, 0], [], []>} : vector<8x16xbf16>, vector<8x16xbf16>, vector<8x8xf32> -> vector<8x8xf32>
    %cst_30 = arith.constant 2.500000e-01 : f32
    %33 = vector.broadcast %cst_30 : f32 to vector<8x8xf32>
    %34 = arith.mulf %32, %33 : vector<8x8xf32>
    %35 = vector.broadcast %7 : vector<1x8xf32> to vector<8x8xf32>
    %36 = arith.subf %34, %35 : vector<8x8xf32>
    %cst_31 = arith.constant dense<0xFF800000> : vector<8xf32>
    %37 = vector.multi_reduction <maximumf>, %36, %cst_31 [1] : vector<8x8xf32> to vector<8xf32>
    %38 = vector.shape_cast %37 : vector<8xf32> to vector<8x1xf32>
    %39 = vector.broadcast %38 : vector<8x1xf32> to vector<8x8xf32>
    %40 = arith.subf %36, %39 : vector<8x8xf32>
    %41 = math.exp %40 : vector<8x8xf32>
    %cst_32 = arith.constant dense<0.000000e+00> : vector<8xf32>
    %42 = vector.multi_reduction <add>, %41, %cst_32 [1] : vector<8x8xf32> to vector<8xf32>
    %43 = vector.shape_cast %42 : vector<8xf32> to vector<8x1xf32>
    %44 = tpu.reciprocal %43 {approx = true} : vector<8x1xf32> -> vector<8x1xf32>
    %45 = vector.broadcast %44 : vector<8x1xf32> to vector<8x8xf32>
    %46 = arith.mulf %41, %45 : vector<8x8xf32>
    %47 = arith.truncf %46 : vector<8x8xf32> to vector<8x8xbf16>
    %48 = arith.truncf %29 : vector<8x16xf32> to vector<8x16xbf16>
    %cst_33 = arith.constant dense<0.000000e+00> : vector<8x16xf32>
    %49 = tpu.matmul %47, %48, %cst_33 {dimension_numbers = #tpu.dot_dimension_numbers<[1], [0], [0], [1], [0, 0, 1, 1], [], []>} : vector<8x8xbf16>, vector<8x16xbf16>, vector<8x16xf32> -> vector<8x16xf32>
    %50 = arith.truncf %49 : vector<8x16xf32> to vector<8x16xbf16>
    %c0_34 = arith.constant 0 : index
    %c0_35 = arith.constant 0 : index
    %c0_36 = arith.constant 0 : index
    %51 = vector.load %arg8[%c0_34, %c0_35, %c0_36] : memref<2x16x32xbf16, #tpu.memory_space<vmem>>, vector<1x16x32xbf16>
    %52 = vector.shape_cast %51 : vector<1x16x32xbf16> to vector<16x32xbf16>
    %cst_37 = arith.constant dense<0.000000e+00> : vector<8x32xf32>
    %53 = tpu.matmul %50, %52, %cst_37 {dimension_numbers = #tpu.dot_dimension_numbers<[1], [0], [0], [1], [0, 0, 1, 1], [], []>} : vector<8x16xbf16>, vector<16x32xbf16>, vector<8x32xf32> -> vector<8x32xf32>
    %54 = vector.broadcast %8 : vector<1x32xf32> to vector<8x32xf32>
    %55 = arith.addf %54, %53 : vector<8x32xf32>
    %c1 = arith.constant 1 : index
    %c0_38 = arith.constant 0 : index
    %c0_39 = arith.constant 0 : index
    %56 = vector.load %arg2[%c1, %c0_38, %c0_39] : memref<2x32x16xbf16, #tpu.memory_space<vmem>>, vector<1x32x16xbf16>
    %57 = vector.shape_cast %56 : vector<1x32x16xbf16> to vector<32x16xbf16>
    %cst_40 = arith.constant dense<0.000000e+00> : vector<8x16xf32>
    %58 = tpu.matmul %1, %57, %cst_40 {dimension_numbers = #tpu.dot_dimension_numbers<[1], [0], [0], [1], [0, 0, 1, 1], [], []>} : vector<8x32xbf16>, vector<32x16xbf16>, vector<8x16xf32> -> vector<8x16xf32>
    %c1_41 = arith.constant 1 : index
    %c0_42 = arith.constant 0 : index
    %c0_43 = arith.constant 0 : index
    %59 = vector.load %arg5[%c1_41, %c0_42, %c0_43] : memref<2x1x16xf32, #tpu.memory_space<vmem>>, vector<1x1x16xf32>
    %60 = vector.shape_cast %59 : vector<1x1x16xf32> to vector<1x16xf32>
    %61 = vector.broadcast %60 : vector<1x16xf32> to vector<8x16xf32>
    %62 = arith.addf %58, %61 : vector<8x16xf32>
    %c1_44 = arith.constant 1 : index
    %c0_45 = arith.constant 0 : index
    %c0_46 = arith.constant 0 : index
    %63 = vector.load %arg3[%c1_44, %c0_45, %c0_46] : memref<2x32x16xbf16, #tpu.memory_space<vmem>>, vector<1x32x16xbf16>
    %64 = vector.shape_cast %63 : vector<1x32x16xbf16> to vector<32x16xbf16>
    %cst_47 = arith.constant dense<0.000000e+00> : vector<8x16xf32>
    %65 = tpu.matmul %1, %64, %cst_47 {dimension_numbers = #tpu.dot_dimension_numbers<[1], [0], [0], [1], [0, 0, 1, 1], [], []>} : vector<8x32xbf16>, vector<32x16xbf16>, vector<8x16xf32> -> vector<8x16xf32>
    %c1_48 = arith.constant 1 : index
    %c0_49 = arith.constant 0 : index
    %c0_50 = arith.constant 0 : index
    %66 = vector.load %arg6[%c1_48, %c0_49, %c0_50] : memref<2x1x16xf32, #tpu.memory_space<vmem>>, vector<1x1x16xf32>
    %67 = vector.shape_cast %66 : vector<1x1x16xf32> to vector<1x16xf32>
    %68 = vector.broadcast %67 : vector<1x16xf32> to vector<8x16xf32>
    %69 = arith.addf %65, %68 : vector<8x16xf32>
    %c1_51 = arith.constant 1 : index
    %c0_52 = arith.constant 0 : index
    %c0_53 = arith.constant 0 : index
    %70 = vector.load %arg4[%c1_51, %c0_52, %c0_53] : memref<2x32x16xbf16, #tpu.memory_space<vmem>>, vector<1x32x16xbf16>
    %71 = vector.shape_cast %70 : vector<1x32x16xbf16> to vector<32x16xbf16>
    %cst_54 = arith.constant dense<0.000000e+00> : vector<8x16xf32>
    %72 = tpu.matmul %1, %71, %cst_54 {dimension_numbers = #tpu.dot_dimension_numbers<[1], [0], [0], [1], [0, 0, 1, 1], [], []>} : vector<8x32xbf16>, vector<32x16xbf16>, vector<8x16xf32> -> vector<8x16xf32>
    %c1_55 = arith.constant 1 : index
    %c0_56 = arith.constant 0 : index
    %c0_57 = arith.constant 0 : index
    %73 = vector.load %arg7[%c1_55, %c0_56, %c0_57] : memref<2x1x16xf32, #tpu.memory_space<vmem>>, vector<1x1x16xf32>
    %74 = vector.shape_cast %73 : vector<1x1x16xf32> to vector<1x16xf32>
    %75 = vector.broadcast %74 : vector<1x16xf32> to vector<8x16xf32>
    %76 = arith.addf %72, %75 : vector<8x16xf32>
    %77 = arith.truncf %62 : vector<8x16xf32> to vector<8x16xbf16>
    %78 = arith.truncf %69 : vector<8x16xf32> to vector<8x16xbf16>
    %cst_58 = arith.constant dense<0.000000e+00> : vector<8x8xf32>
    %79 = tpu.matmul %77, %78, %cst_58 {dimension_numbers = #tpu.dot_dimension_numbers<[1], [1], [0], [0], [0, 0, 1, 0], [], []>} : vector<8x16xbf16>, vector<8x16xbf16>, vector<8x8xf32> -> vector<8x8xf32>
    %cst_59 = arith.constant 2.500000e-01 : f32
    %80 = vector.broadcast %cst_59 : f32 to vector<8x8xf32>
    %81 = arith.mulf %79, %80 : vector<8x8xf32>
    %82 = vector.broadcast %7 : vector<1x8xf32> to vector<8x8xf32>
    %83 = arith.subf %81, %82 : vector<8x8xf32>
    %cst_60 = arith.constant dense<0xFF800000> : vector<8xf32>
    %84 = vector.multi_reduction <maximumf>, %83, %cst_60 [1] : vector<8x8xf32> to vector<8xf32>
    %85 = vector.shape_cast %84 : vector<8xf32> to vector<8x1xf32>
    %86 = vector.broadcast %85 : vector<8x1xf32> to vector<8x8xf32>
    %87 = arith.subf %83, %86 : vector<8x8xf32>
    %88 = math.exp %87 : vector<8x8xf32>
    %cst_61 = arith.constant dense<0.000000e+00> : vector<8xf32>
    %89 = vector.multi_reduction <add>, %88, %cst_61 [1] : vector<8x8xf32> to vector<8xf32>
    %90 = vector.shape_cast %89 : vector<8xf32> to vector<8x1xf32>
    %91 = tpu.reciprocal %90 {approx = true} : vector<8x1xf32> -> vector<8x1xf32>
    %92 = vector.broadcast %91 : vector<8x1xf32> to vector<8x8xf32>
    %93 = arith.mulf %88, %92 : vector<8x8xf32>
    %94 = arith.truncf %93 : vector<8x8xf32> to vector<8x8xbf16>
    %95 = arith.truncf %76 : vector<8x16xf32> to vector<8x16xbf16>
    %cst_62 = arith.constant dense<0.000000e+00> : vector<8x16xf32>
    %96 = tpu.matmul %94, %95, %cst_62 {dimension_numbers = #tpu.dot_dimension_numbers<[1], [0], [0], [1], [0, 0, 1, 1], [], []>} : vector<8x8xbf16>, vector<8x16xbf16>, vector<8x16xf32> -> vector<8x16xf32>
    %97 = arith.truncf %96 : vector<8x16xf32> to vector<8x16xbf16>
    %c1_63 = arith.constant 1 : index
    %c0_64 = arith.constant 0 : index
    %c0_65 = arith.constant 0 : index
    %98 = vector.load %arg8[%c1_63, %c0_64, %c0_65] : memref<2x16x32xbf16, #tpu.memory_space<vmem>>, vector<1x16x32xbf16>
    %99 = vector.shape_cast %98 : vector<1x16x32xbf16> to vector<16x32xbf16>
    %cst_66 = arith.constant dense<0.000000e+00> : vector<8x32xf32>
    %100 = tpu.matmul %97, %99, %cst_66 {dimension_numbers = #tpu.dot_dimension_numbers<[1], [0], [0], [1], [0, 0, 1, 1], [], []>} : vector<8x16xbf16>, vector<16x32xbf16>, vector<8x32xf32> -> vector<8x32xf32>
    %101 = arith.addf %55, %100 : vector<8x32xf32>
    %c0_67 = arith.constant 0 : index
    %c0_68 = arith.constant 0 : index
    %c0_69 = arith.constant 0 : index
    %102 = vector.load %arg11[%c0_67, %c0_68, %c0_69] : memref<1x8x32xf32, #tpu.memory_space<vmem>>, vector<1x8x32xf32>
    %103 = vector.shape_cast %102 : vector<1x8x32xf32> to vector<8x32xf32>
    %104 = vector.shape_cast %101 : vector<8x32xf32> to vector<1x8x32xf32>
    tpu.vector_store %arg11[%c0_67, %c0_68, %c0_69], %104 {strides = array<i32>} : memref<1x8x32xf32, #tpu.memory_space<vmem>>, vector<1x8x32xf32>,
    return
  }
  func.func @transform_0(%arg0: i32) -> (i32, i32, i32) {
    %c0_i32 = arith.constant 0 : i32
    %c0_i32_0 = arith.constant 0 : i32
    %c0_i32_1 = arith.constant 0 : i32
    return %arg0, %c0_i32, %c0_i32_0 : i32, i32, i32
  }
  func.func @transform_1(%arg0: i32) -> (i32, i32, i32) {
    %c0_i32 = arith.constant 0 : i32
    %c0_i32_0 = arith.constant 0 : i32
    %c0_i32_1 = arith.constant 0 : i32
    %c0_i32_2 = arith.constant 0 : i32
    return %c0_i32, %c0_i32_0, %c0_i32_1 : i32, i32, i32
  }
  func.func @transform_2(%arg0: i32) -> (i32, i32, i32) {
    %c0_i32 = arith.constant 0 : i32
    %c0_i32_0 = arith.constant 0 : i32
    %c0_i32_1 = arith.constant 0 : i32
    %c0_i32_2 = arith.constant 0 : i32
    return %c0_i32, %c0_i32_0, %c0_i32_1 : i32, i32, i32
  }
  func.func @transform_3(%arg0: i32) -> (i32, i32, i32) {
    %c0_i32 = arith.constant 0 : i32
    %c0_i32_0 = arith.constant 0 : i32
    %c0_i32_1 = arith.constant 0 : i32
    %c0_i32_2 = arith.constant 0 : i32
    return %c0_i32, %c0_i32_0, %c0_i32_1 : i32, i32, i32
  }
  func.func @transform_4(%arg0: i32) -> (i32, i32, i32) {
    %c0_i32 = arith.constant 0 : i32
    %c0_i32_0 = arith.constant 0 : i32
    %c0_i32_1 = arith.constant 0 : i32
    %c0_i32_2 = arith.constant 0 : i32
    return %c0_i32, %c0_i32_0, %c0_i32_1 : i32, i32, i32
  }
  func.func @transform_5(%arg0: i32) -> (i32, i32, i32) {
    %c0_i32 = arith.constant 0 : i32
    %c0_i32_0 = arith.constant 0 : i32
    %c0_i32_1 = arith.constant 0 : i32
    %c0_i32_2 = arith.constant 0 : i32
    return %c0_i32, %c0_i32_0, %c0_i32_1 : i32, i32, i32
  }
  func.func @transform_6(%arg0: i32) -> (i32, i32, i32) {
    %c0_i32 = arith.constant 0 : i32
    %c0_i32_0 = arith.constant 0 : i32
    %c0_i32_1 = arith.constant 0 : i32
    %c0_i32_2 = arith.constant 0 : i32
    return %c0_i32, %c0_i32_0, %c0_i32_1 : i32, i32, i32
  }
  func.func @transform_7(%arg0: i32) -> (i32, i32, i32) {
    %c0_i32 = arith.constant 0 : i32
    %c0_i32_0 = arith.constant 0 : i32
    %c0_i32_1 = arith.constant 0 : i32
    %c0_i32_2 = arith.constant 0 : i32
    return %c0_i32, %c0_i32_0, %c0_i32_1 : i32, i32, i32
  }
  func.func @transform_8(%arg0: i32) -> (i32, i32) {
    %c0_i32 = arith.constant 0 : i32
    %c0_i32_0 = arith.constant 0 : i32
    %c0_i32_1 = arith.constant 0 : i32
    return %c0_i32, %c0_i32_0 : i32, i32
  }
  func.func @transform_9(%arg0: i32) -> (i32, i32, i32) {
    %c0_i32 = arith.constant 0 : i32
    %c0_i32_0 = arith.constant 0 : i32
    %c0_i32_1 = arith.constant 0 : i32
    return %arg0, %c0_i32, %c0_i32_0 : i32, i32, i32
  }
  func.func @transform_10(%arg0: i32) -> (i32, i32, i32) {
    %c0_i32 = arith.constant 0 : i32
    %c0_i32_0 = arith.constant 0 : i32
    %c0_i32_1 = arith.constant 0 : i32
    return %arg0, %c0_i32, %c0_i32_0 : i32, i32, i32
  }
}

</mosaic_0001>

<bundles_post_ra>
// kernel: tpu_custom_call.1
= control target key start
LH: loop header
LB: loop body
LE: loop exit
PB: predicated region body
PF: predicated region fallthrough
CT: control target
= control target key end

     0   :  { %15 = vsyncpa [#allocation3], 0  ;;  %s1790_s0 = inlined_call_operand.vmem [shape: bf16[2,8,32], index: 0, kind: input, shape index: {}]   ;;  %s1791_s1 = inlined_call_operand.vmem [shape: bf16[2,32,16], index: 1, kind: input, shape index: {}]   ;;  %s1792_s2 = inlined_call_operand.vmem [shape: bf16[2,32,16], index: 2, kind: input, shape index: {}]   ;;  %s1793_s3 = inlined_call_operand.vmem [shape: bf16[2,32,16], index: 3, kind: input, shape index: {}]   ;;  %s1794_s4 = inlined_call_operand.vmem [shape: f32[2,1,16], index: 4, kind: input, shape index: {}]   ;;  %s1795_s5 = inlined_call_operand.vmem [shape: f32[2,1,16], index: 5, kind: input, shape index: {}]   ;;  %s1796_s6 = inlined_call_operand.vmem [shape: f32[2,1,16], index: 6, kind: input, shape index: {}]   ;;  %s1797_s7 = inlined_call_operand.vmem [shape: bf16[2,16,32], index: 7, kind: input, shape index: {}]   ;;  %s1798_s8 = inlined_call_operand.vmem [shape: f32[1,32], index: 8, kind: input, shape index: {}]   ;;  %s1799_s9 = inlined_call_operand.vmem [shape: f32[2,1,8], index: 9, kind: input, shape index: {}]   ;;  %s1800_s10 = inlined_call_operand.hbm [shape: f32[2,8,32], index: 10, kind: output, shape index: {}]  }
   0x1   :  { %17 = vsyncpa [#allocation3 + $0x1], 0  ;;  %s1543_s13 = smov 0   ;;  %s1545_s14 = smov 0  }
   0x2   :  { %s1547_s15 = smov 0   ;;  %s1549_s16 = smov 0  }
   0x3 LB: > { %s1564_s17 = sadd.s32 4294967295, %s1483_s16   ;;  %s1186_s18 = sadd.s32 4294967294, %s1483_s16   ;;  %s1483_s16 = sphi %s1549_s16, %s1806_s16   ;;  %s1479_s15 = sphi %s1547_s15, %s1805_s15   ;;  %s1475_s14 = sphi %s1545_s14, %s1804_s14   ;;  %s1471_s13 = sphi %s1543_s13, %s1803_s13  }
   0x4   : > { %s1568_s19 = sadd.s32 1, %s1483_s16   ;;  %s250_s20 = sadd.s32 1, %s1479_s15 }
   0x5   : > { %s247_s21 = ssub.s32 %s1483_s16, %s1568_s19  ;;  %p260_p0 = scmp.ne.s32.totalorder %s1479_s15, %s1475_s14 }
   0x6   : > { %p248_p1 = scmp.eq.s32.totalorder %s247_s21, 0  ;;  %p261_p2 = scmp.eq.s32.totalorder %s1564_s17, 1 }
   0x7   : > { %p266_p3 = scmp.ne.s32.totalorder %s1475_s14, %s1471_s13  ;;  %p267_p4 = scmp.eq.s32.totalorder %s1186_s18, 1 }
   0x8   : > { %s1579_s22 = scalar_select %p248_p1, %s1479_s15, %s250_s20  }
   0x9   : > { %p1581_p5 = por %p261_p2, %p260_p0  ;;  %p1585_p6 = por %p267_p4, %p266_p3 }
   0xa   : > { %p1189_p7 = scmp.ge.s32.totalorder %s1483_s16, 1  ;;  %p322_p8 = scmp.lt.s32.totalorder %s1483_s16, 3 }
   0xc   : > { %p323_p9 = pnand %p1189_p7, %p322_p8 }
   0xd   : > { %p362_p10 = scmp.lt.s32.totalorder (!%p323_p9), %s1564_s17, 1  ;;  %s359_s29 = sand.u32 (!%p323_p9), 1, %s1475_s14  }
   0xe   : > { %326 = sbr.rel (%p323_p9) target bundleno = 2067 (0x813), region = 60  ;;  %s1190_s30 = sshll.u32 (!%p323_p9), %s359_s29, 3 }
   0xf   : > { %s361_s21 = scalar_lea.vmem (!%p323_p9), [#allocation2], %s1190_s30  ;;  %s1487_s30 = smov (!%p323_p9), [#allocation2]  }
  0x10   : > { %s1118_s25 = sshll.u32 (!%p323_p9), %s361_s21, 4  ;;  %s1427_s11 = sshll.u32 (!%p323_p9), %s1487_s30, 4  ;;  %s1750_s25 = int_to_ptr.vmem [resolvable:$true] %s1118_s25  ;;  %s1428_s11 = int_to_ptr.vmem [resolvable:$false] %s1427_s11 }
  0x11   : > { %s1423_s28 = scalar_lea.vmem (!%p323_p9), %s1750_s25, 128  ;;  %s1429_s12 = scalar_lea.vmem (!%p323_p9), %s1428_s11, 256 }
  0x12   : > { %p1424_p11 = scmp.ne.s32.totalorder (!%p323_p9), %s1750_s25, %s1423_s28  ;;  %p1430_p0 = scmp.lt.s32.totalorder (!%p323_p9), %s1750_s25, %s1428_s11 }
  0x13   : > { %v1401_v0 = vld [vmem:[%s1792_s2 + $0x8] sm:$0xff]   ;;  %v1485_v1 = vmov 0.0   ;;  %v1403_v3 = vld [vmem:[%s1792_s2] sm:$0xff]   ;;  %vm1486_vm0 = vmmov 0   ;;  %s1611_s18 = scalar_select %p362_p10, %s1564_s17, 1  ;;  %vm398_vm1 = vcmask 261120   ;;  %v619_v23 = vlaneseq }
  0x14   : > { %1284 = vmatprep.subr.bf16.mxu1 %v1485_v1  ;;  %1276 = vmatprep.subr.bf16.mxu0 %v1485_v1  ;;  %v1402_v2 = vld [vmem:[%s1791_s1 + $0x8] sm:$0xff]   ;;  %v1404_v4 = vld [vmem:[%s1791_s1] sm:$0xff]   ;;  %vm570_vm2 = vcmask 130048   ;;  %vm625_vm3 = vcmask 64512   ;;  %vm642_vm4 = vcmask 1043456   ;;  %v1409_v55 = vld [vmem:[%s1791_s1 + $0x18] sm:$0xff]   ;;  %p1425_p12 = pnand %p1424_p11, %p1581_p5  ;;  %p1431_p1 = scmp.lt.s32.totalorder %s1429_s12, %s1423_s28 }
  0x15   : > { %1285 = vmatpush3.bf16.msra.mxu1 %v1401_v0  ;;  %1288 = vmatprep.mubr.msk.bf16.mxu1 %vm1486_vm0, %v1485_v1  ;;  %s1191_s20 = sshll.u32 %s1611_s18, 2  ;;  %v1196_v6 = vld [vmem:[%s1795_s5] ss:$0 sm:$0xff]  ;;  %v1405_v21 = vld [vmem:[%s1793_s3 + $0x8] sm:$0xff]   ;;  %s368_s27 = scalar_lea.vmem %s1799_s9, %s1611_s18  ;;  %v620_v26 = vshrl.u32 %v619_v23, 7  ;;  %v1411_v56 = vld [vmem:[%s1791_s1 + $0x10] sm:$0xff]  }
  0x16   : > { %1277 = vmatpush3.bf16.msra.mxu0 %v1402_v2  ;;  %1286 = vmatprep.subr.bf16.mxu1 %v1485_v1  ;;  %s365_s26 = scalar_lea.vmem %s1790_s0, %s1191_s20  ;;  %v1192_v10 = vld [vmem:[%s1794_s4] ss:$0 sm:$0xff]  ;;  %v1408_v58 = vld [vmem:[%s1792_s2 + $0x18] sm:$0xff]   ;;  %v1410_v62 = vld [vmem:[%s1792_s2 + $0x10] sm:$0xff]   ;;  %s1243_s20 = sshll.u32 %s1564_s17, 7 }
  0x17   : > { %1278 = vmatprep.subr.bf16.mxu0 %v1485_v1  ;;  %1280 = vmatprep.mubr.msk.bf16.mxu0 %vm1486_vm0, %v1485_v1  ;;  %v1620_v5 = vld [vmem:[%s365_s26] sm:$0xf]  ;;  %v621_v28 = vsub.s32 0, %v620_v26  ;;  %s1748_s18 = scalar_lea.hbm %s1800_s10, %s1243_s20  ;;  %s1105_s17 = scalar_lea.sflag [#allocation3], %s359_s29 }
  0x18   : > { %v1406_v22 = vld [vmem:[%s1793_s3] sm:$0xff]   ;;  %p1426_p13 = pneg %p1425_p12  ;;  %p1432_p2 = por %p1431_p1, %p1430_p0 }
  0x19   : > { %1287 = vmatpush3.bf16.msra.mxu1 %v1403_v3  ;;  %v371_v24 = vld [vmem:[%s368_s27] sm:$0x1] }
  0x1a   : > { %1279 = vmatpush3.bf16.msra.mxu0 %v1404_v4  ;;  %1300 = vmatprep.subr.bf16.mxu1 %v1485_v1  ;;  %v372_v25 = vsub.f32 1.0, %v371_v24  ;;  %v1200_v42 = vld [vmem:[%s1796_s6] ss:$0 sm:$0xff]  ;;  %p1433_p3 = pnand %p1432_p2, %p1426_p13 }
  0x1b   : > { %1292 = vmatprep.subr.bf16.mxu0 %v1485_v1  ;;  %v1407_v50 = vld [vmem:[%s1797_s7] sm:$0xff]  }
  0x1c   : > { %1289 = vmatmul.mubr.msk.bf16.vlgmr.msra.gmra.mxu1 %vm398_vm1, %v1620_v5  ;;  %v373_v27 = vmul.f32 1000000.0, %v372_v25 }
  0x1d   : > { %1281 = vmatmul.mubr.msk.bf16.vlgmr.msra.gmra.mxu0 %vm398_vm1, %v1620_v5  ;;  %1302 = vmatprep.mubr.msk.bf16.mxu1 %vm1486_vm0, %v1485_v1 }
  0x1e   : > { %1296 = vmatprep.mubr.msk.bf16.mxu0 %vm1486_vm0, %v1485_v1  ;;  %1293 = vmatpush3.bf16.msra.mxu0 %v1405_v21  ;;  %v1658_v29 = vrot.slane %v373_v27, %v621_v28  ;;  %v1412_v21 = vld [vmem:[%s1793_s3 + $0x18] sm:$0xff]  }
  0x1f   : > { %1294 = vmatprep.subr.bf16.mxu0 %v1485_v1 }
  0x22   : > { %1295 = vmatpush3.bf16.msra.mxu0 %v1406_v22  ;;  %v1413_v22 = vld [vmem:[%s1793_s3 + $0x10] sm:$0xff]  }
  0x23   : > { %1306 = vmatprep.subr.bf16.mxu0 %v1485_v1 }
  0x25   : > { %1297 = vmatmul.mubr.msk.bf16.vlgmr.msra.gmra.mxu0 %vm398_vm1, %v1620_v5 }
  0x26   : > { %1308 = vmatprep.mubr.msk.bf16.mxu0 %vm1486_vm0, %v1485_v1 }
  0xdc   : > { %v499_v7 = vpop.f32.mrf.mxu1 }
  0xdd   : > { %v500_v8 = vadd.f32 %v1196_v6, %v499_v7  ;;  %v436_v9 = vpop.f32.mrf.mxu0 }
  0xde   : > { %v1290_v11 = vpop.f32.mrf.mxu1  ;;  %v437_v16 = vadd.f32 %v1192_v10, %v436_v9  ;;  %v1223_v10 = vld [vmem:[%s1795_s5 + $0x1] ss:$0 sm:$0xff] }
  0xdf   : > { %v569_v12 = vpack.c.bf16 %v500_v8, %v500_v8  ;;  %v1282_v13 = vpop.f32.mrf.mxu0 }
  0xe0   : > { %v502_v14 = vpop.f32.mrf.mxu1  ;;  %v568_v20 = vpack.c.bf16 %v437_v16, %v437_v16 }
  0xe1   : > { %v575_v15 = vsel %vm570_vm2, %v569_v12, 0  ;;  %v439_v17 = vpop.f32.mrf.mxu0  ;;  %v1214_v14 = vld [vmem:[%s1794_s4 + $0x1] ss:$0 sm:$0xff] }
  0xe2   : > { %v1291_v18 = vpop.f32.mrf.mxu1  ;;  %1301 = vmatpush3.bf16.xpose.msra.mxu1 %v575_v15 }
  0xe3   : > { %v1283_v19 = vpop.f32.mrf.mxu0  ;;  %1312 = vmatprep.subr.bf16.mxu1 %v1485_v1 }
  0xe5   : > { %v562_v43 = vpop.f32.mrf.mxu0 }
  0xe6   : > { %v563_v44 = vadd.f32 %v1200_v42, %v562_v43 }
  0xe7   : > { %v1298_v45 = vpop.f32.mrf.mxu0 }
  0xe8   : > { %v638_v46 = vpack.c.bf16 %v563_v44, %v563_v44 }
  0xe9   : > { %1303 = vmatmul.mubr.msk.bf16.vlgmr.msra.gmra.mxu1 %vm570_vm2, %v568_v20  ;;  %v565_v47 = vpop.f32.mrf.mxu0 }
  0xea   : > { %1314 = vmatprep.mubr.msk.bf16.mxu1 %vm1486_vm0, %v1485_v1  ;;  %v644_v48 = vsel %vm642_vm4, %v638_v46, 0  ;;  %1313 = vmatpush3.bf16.msra.mxu1 %v1407_v50 }
  0xeb   : > { %v1299_v49 = vpop.f32.mrf.mxu0  ;;  %1307 = vmatpush3.bf16.msra.mxu0 %v644_v48  ;;  %1326 = vmatprep.subr.bf16.mxu1 %v1485_v1 }
  0xec   : > { %1318 = vmatprep.subr.bf16.mxu0 %v1485_v1 }
 0x1a9   : > { %v611_v30 = vpop.f32.mrf.mxu1 }
 0x1aa   : > { %v617_v31 = vmul.f32 0.25, %v611_v30 }
 0x1ab   : > { %v1304_v32 = vpop.f32.mrf.mxu1 }
 0x1ac   : > { %v624_v33 = vsub.f32 %v617_v31, %v1658_v29 }
 0x1ad   : > { %v614_v34 = vpop.f32.mrf.mxu1 }
 0x1ae   : > { %v626_v35 = vsel %vm625_vm3, %v624_v33, -inf }
 0x1af   : > { %627 = vmax.xlane.f32.xlu0 %v626_v35  ;;  %v1305_v36 = vpop.f32.mrf.mxu1 }
 0x238   : > { %v628_v37 = vpop.xlane.xlu0 %627 }
 0x239   : > { %v629_v38 = vsub.f32 %v624_v33, %v628_v37 }
 0x23b   : > { %v630_v39 = vmul.f32 1.442695, %v629_v38 }
 0x23d   : > { %1415 = vpow2.f32 %v630_v39 }
 0x24a   : > { %v1416_v40 = vpop.eup %1415 }
 0x24b   : > { %v632_v41 = vsel %vm625_vm3, %v1416_v40, 0.0 }
 0x24c   : > { %633 = vadd.xlane.f32.xlu0 %v632_v41  ;;  %v1414_v41 = vld [vmem:[%s1797_s7 + $0x8] sm:$0xff]  }
 0x2d5   : > { %v634_v51 = vpop.xlane.xlu0 %633 }
 0x2d6   : > { %1417 = vrcp.f32 %v634_v51  ;;  %v1208_v51 = vld [vmem:[%s1798_s8] ss:$0 sm:$0xff] }
 0x2e3   : > { %v1418_v52 = vpop.eup %1417 }
 0x2e4   : > { %v636_v53 = vmul.f32 %v1418_v52, %v1416_v40 }
 0x2e6   : > { %v637_v54 = vpack.c.bf16 %v636_v53, %v636_v53 }
 0x2e8   : > { %1309 = vmatmul.mubr.msk.bf16.vlgmr.msra.gmra.mxu0 %vm625_vm3, %v637_v54 }
 0x2e9   : > { %1322 = vmatprep.mubr.msk.bf16.mxu0 %vm1486_vm0, %v1485_v1  ;;  %1319 = vmatpush3.bf16.msra.mxu0 %v1409_v55 }
 0x2ea   : > { %1320 = vmatprep.subr.bf16.mxu0 %v1485_v1 }
 0x2ed   : > { %1321 = vmatpush3.bf16.msra.mxu0 %v1411_v56 }
 0x2ee   : > { %1334 = vmatprep.subr.bf16.mxu0 %v1485_v1 }
 0x2f0   : > { %1323 = vmatmul.mubr.msk.bf16.vlgmr.msra.gmra.mxu0 %vm398_vm1, %v1620_v5 }
 0x2f1   : > { %1338 = vmatprep.mubr.msk.bf16.mxu0 %vm1486_vm0, %v1485_v1  ;;  %1335 = vmatpush3.bf16.msra.mxu0 %v1412_v21 }
 0x2f2   : > { %1336 = vmatprep.subr.bf16.mxu0 %v1485_v1 }
 0x2f5   : > { %1337 = vmatpush3.bf16.msra.mxu0 %v1413_v22 }
 0x2f6   : > { %1348 = vmatprep.subr.bf16.mxu0 %v1485_v1 }
 0x2f8   : > { %1339 = vmatmul.mubr.msk.bf16.vlgmr.msra.gmra.mxu0 %vm398_vm1, %v1620_v5 }
 0x2f9   : > { %1350 = vmatprep.mubr.msk.bf16.mxu0 %vm1486_vm0, %v1485_v1 }
 0x3a8   : > { %v680_v57 = vpop.f32.mrf.mxu0 }
 0x3a9   : > { %v686_v59 = vpack.c.bf16 %v680_v57, %v680_v57 }
 0x3aa   : > { %v1310_v60 = vpop.f32.mrf.mxu0 }
 0x3ab   : > { %1315 = vmatmul.mubr.msk.bf16.vlgmr.msra.gmra.mxu1 %vm570_vm2, %v686_v59 }
 0x3ac   : > { %v683_v61 = vpop.f32.mrf.mxu0  ;;  %1327 = vmatpush3.bf16.msra.mxu1 %v1408_v58  ;;  %1330 = vmatprep.mubr.msk.bf16.mxu1 %vm1486_vm0, %v1485_v1 }
 0x3ad   : > { %1328 = vmatprep.subr.bf16.mxu1 %v1485_v1 }
 0x3ae   : > { %v1311_v63 = vpop.f32.mrf.mxu0 }
 0x3b0   : > { %1329 = vmatpush3.bf16.msra.mxu1 %v1410_v62  ;;  %v804_v0 = vpop.f32.mrf.mxu0 }
 0x3b1   : > { %1342 = vmatprep.subr.bf16.mxu1 %v1485_v1  ;;  %v805_v18 = vadd.f32 %v1214_v14, %v804_v0 }
 0x3b2   : > { %v1324_v2 = vpop.f32.mrf.mxu0 }
 0x3b3   : > { %1331 = vmatmul.mubr.msk.bf16.vlgmr.msra.gmra.mxu1 %vm398_vm1, %v1620_v5  ;;  %v940_v20 = vpack.c.bf16 %v805_v18, %v805_v18 }
 0x3b4   : > { %1344 = vmatprep.mubr.msk.bf16.mxu1 %vm1486_vm0, %v1485_v1  ;;  %v807_v3 = vpop.f32.mrf.mxu0 }
 0x3b6   : > { %v1325_v4 = vpop.f32.mrf.mxu0 }
 0x3b8   : > { %v934_v35 = vpop.f32.mrf.mxu0 }
 0x46b   : > { %v1702_v6 = vpop.f32.mrf.mxu1 }
 0x46c   : > { %v744_v52 = vadd.f32 %v1208_v51, %v1702_v6 }
 0x46d   : > { %v1316_v7 = vpop.f32.mrf.mxu1 }
 0x46f   : > { %v735_v8 = vpop.f32.mrf.mxu1 }
 0x471   : > { %v1317_v9 = vpop.f32.mrf.mxu1 }
 0x473   : > { %v869_v11 = vpop.f32.mrf.mxu1 }
 0x474   : > { %v870_v12 = vadd.f32 %v1223_v10, %v869_v11 }
 0x475   : > { %v1332_v13 = vpop.f32.mrf.mxu1 }
 0x476   : > { %v941_v15 = vpack.c.bf16 %v870_v12, %v870_v12 }
 0x477   : > { %v872_v16 = vpop.f32.mrf.mxu1 }
 0x478   : > { %v946_v17 = vsel %vm570_vm2, %v941_v15, 0 }
 0x479   : > { %v1333_v19 = vpop.f32.mrf.mxu1  ;;  %1343 = vmatpush3.bf16.xpose.msra.mxu1 %v946_v17 }
 0x47a   : > { %1354 = vmatprep.subr.bf16.mxu1 %v1485_v1 }
 0x480   : > { %1345 = vmatmul.mubr.msk.bf16.vlgmr.msra.gmra.mxu1 %vm570_vm2, %v940_v20 }
 0x481   : > { %1356 = vmatprep.mubr.msk.bf16.mxu1 %vm1486_vm0, %v1485_v1  ;;  %v1232_v1 = vld [vmem:[%s1796_s6 + $0x1] ss:$0 sm:$0xff]  ;;  %1355 = vmatpush3.bf16.msra.mxu1 %v1414_v41 }
 0x482   : > { %v935_v36 = vadd.f32 %v1232_v1, %v934_v35 }
 0x484   : > { %v1002_v37 = vpack.c.bf16 %v935_v36, %v935_v36 }
 0x486   : > { %v1007_v39 = vsel %vm642_vm4, %v1002_v37, 0 }
 0x487   : > { %1349 = vmatpush3.bf16.msra.mxu0 %v1007_v39 }
 0x540   : > { %v982_v23 = vpop.f32.mrf.mxu1 }
 0x541   : > { %v988_v24 = vmul.f32 0.25, %v982_v23 }
 0x542   : > { %v1346_v25 = vpop.f32.mrf.mxu1 }
 0x543   : > { %v989_v26 = vsub.f32 %v988_v24, %v1658_v29  ;;  %v1340_v29 = vpop.f32.mrf.mxu0 }
 0x544   : > { %v985_v27 = vpop.f32.mrf.mxu1 }
 0x545   : > { %v990_v28 = vsel %vm625_vm3, %v989_v26, -inf  ;;  %v937_v38 = vpop.f32.mrf.mxu0 }
 0x546   : > { %991 = vmax.xlane.f32.xlu1 %v990_v28  ;;  %v1347_v30 = vpop.f32.mrf.mxu1 }
 0x547   : > { %v1341_v40 = vpop.f32.mrf.mxu0 }
 0x5cf   : > { %v992_v31 = vpop.xlane.xlu1 %991 }
 0x5d0   : > { %v993_v32 = vsub.f32 %v989_v26, %v992_v31 }
 0x5d2   : > { %v994_v33 = vmul.f32 1.442695, %v993_v32 }
 0x5d4   : > { %1419 = vpow2.f32 %v994_v33 }
 0x5e1   : > { %v1420_v34 = vpop.eup %1419 }
 0x5e2   : > { %v996_v5 = vsel %vm625_vm3, %v1420_v34, 0.0 }
 0x5e3   : > { %997 = vadd.xlane.f32.xlu1 %v996_v5 }
 0x66c   : > { %v998_v42 = vpop.xlane.xlu1 %997 }
 0x66d   : > { %1421 = vrcp.f32 %v998_v42 }
 0x67a   : > { %v1422_v43 = vpop.eup %1421 }
 0x67b   : > { %v1000_v44 = vmul.f32 %v1422_v43, %v1420_v34 }
 0x67d   : > { %v1001_v45 = vpack.c.bf16 %v1000_v44, %v1000_v44 }
 0x67f   : > { %1351 = vmatmul.mubr.msk.bf16.vlgmr.msra.gmra.mxu0 %vm625_vm3, %v1001_v45 }
 0x73f   : > { %v1043_v46 = vpop.f32.mrf.mxu0 }
 0x740   : > { %v1049_v47 = vpack.c.bf16 %v1043_v46, %v1043_v46 }
 0x741   : > { %v1352_v48 = vpop.f32.mrf.mxu0 }
 0x742   : > { %1357 = vmatmul.mubr.msk.bf16.vlgmr.msra.gmra.mxu1 %vm570_vm2, %v1049_v47 }
 0x743   : > { %v1046_v49 = vpop.f32.mrf.mxu0 }
 0x745   : > { %v1353_v50 = vpop.f32.mrf.mxu0 }
 0x802   : > { %v1096_v53 = vpop.f32.mrf.mxu1 }
 0x803   : > { %v1102_v54 = vadd.f32 %v1096_v53, %v744_v52 }
 0x804   : > { %v1358_v55 = vpop.f32.mrf.mxu1 }
 0x805   : > { %1103 = vst.msk [vmem:[%s361_s21] sm:$0xff] %vm398_vm1, %v1102_v54 }
 0x806   : > { %v1099_v56 = vpop.f32.mrf.mxu1 }
 0x807   : > { %1436 = shalt.err (!%p1433_p3)
}
 0x808   : > { %s1437_s20 = scalar_lea.hbm %s1748_s18, 128  ;;  %s1441_s26 = scalar_lea.hbm %s1800_s10, 256 }
 0x809   : > { %p1438_p4 = scmp.ne.s32.totalorder %s1748_s18, %s1437_s20  ;;  %p1442_p9 = scmp.lt.s32.totalorder %s1748_s18, %s1800_s10 }
 0x80a   : > { %p1443_p10 = scmp.lt.s32.totalorder %s1441_s26, %s1437_s20 }
 0x80b   : > { %p1439_p7 = pnand %p1438_p4, %p1581_p5 }
 0x80c   : > { %p1444_p11 = por %p1443_p10, %p1442_p9 }
 0x80d   : > { %p1440_p8 = pneg %p1439_p7 }
 0x80f   : > { %p1445_p12 = pnand %p1444_p11, %p1440_p8 }
 0x811   : > { %1448 = shalt.err (!%p1445_p12)
}
 0x812   : > { %1360 = dma.vmem_to_hbm [thread:$0]  (%p1581_p5), %s1750_s25, 128, %s1748_s18, %s1105_s17   ;;  %v1359_v57 = vpop.f32.mrf.mxu1 }
 0x813 PF: > { %p1366_p13 = scmp.ge.s32.totalorder %s1483_s16, 2  ;;  %s1130_s28 = sand.u32 1, %s1471_s13  }
 0x814   : > { %s1131_s11 = scalar_lea.sflag [#allocation3], %s1130_s28 }
 0x815   : > { %p1363_p0 = pnand %p1366_p13, %p1585_p6 }
 0x817   : > { %p1364_p1 = pneg %p1363_p0 }
 0x819   : > { %1466 = dma.done.wait (%p1364_p1), %s1131_s11, 128  }
 0x81a   : > { %1468 = vsyncadd (%p1364_p1), %s1131_s11, 4294967168  ;;  %p20_p2 = scmp.ge.s32.totalorder %s1568_s19, 4   ;;  %s1803_s13 = smov %s1475_s14 }
 0x81b   : > { %s1804_s14 = smov %s1479_s15  ;;  %s1805_s15 = smov %s1579_s22 }
 0x81c   : > { %s1806_s16 = smov %s1568_s19  ;;  %22 = sbr.rel (!%p20_p2) target bundleno = 3 (0x3), region = 105 }
 0x821   :  { %1136 = vsyncpa [#allocation3], 1 }
 0x822   :  { %1138 = vsyncpa [#allocation3 + $0x1], 1 }

</bundles_post_ra>
